<compile_context>
chip_gen: v7x
topology: tpu7x:2x2x1
jax: 0.10.0
libtpu: 0.0.40
codegen_flags: <defaults>
</compile_context>

<pallas_src>
import jax
import jax.numpy as jnp
from jax.experimental import pallas as pl
from jax.experimental.pallas import tpu as pltpu


# ----------------------------- kernel bodies ------------------------------ #

def _fill_uv(x_ref, w1_ref, vecs_ref, u_sc, v_sc):
    """Fill per-word first-layer activations for the whole batch block.

    u = x @ W1_left + b1   (b1 folded here: S*R adds, not S*S*R)
    v = x @ W1_right
    Single fused MXU matmul against the (D, 2R) weight.
    """
    tb, s, d = x_ref.shape
    rank = u_sc.shape[-1]
    x2d = x_ref[...].reshape(tb * s, d)
    uv = jnp.dot(x2d, w1_ref[...], preferred_element_type=jnp.float32)  # (TB*S, 2R)
    b1 = vecs_ref[0:1, :]                                               # (1, R)
    u_sc[...] = (uv[:, :rank] + b1).reshape(tb, s, rank)
    v_sc[...] = uv[:, rank:].reshape(tb, s, rank)


def _pair_hidden(u_sc, v_sc, i_tile, ts):
    """relu(u_i + v_j) for the current i-tile -> (TB, TS, S, R)."""
    start = pl.multiple_of(i_tile * ts, ts)
    u_t = u_sc[:, pl.ds(start, ts), :]                # (TB, TS, R)
    v = v_sc[...]                                     # (TB, S,  R)
    return jnp.maximum(u_t[:, :, None, :] + v[:, None, :, :], 0.0)


def _mlp1_kernel(x_ref, w1_ref, vecs_ref, out_ref, u_sc, v_sc):
    i_tile = pl.program_id(1)

    @pl.when(i_tile == 0)
    def _():
        _fill_uv(x_ref, w1_ref, vecs_ref, u_sc, v_sc)

    ts = out_ref.shape[1]
    h = _pair_hidden(u_sc, v_sc, i_tile, ts)          # (TB, TS, S, R)
    wlast = vecs_ref[1:2, :]                          # (1, R)
    blast = vecs_ref[3:4, 0:1]                        # (1, 1)
    out_ref[...] = jnp.sum(h * wlast, axis=-1) + blast


def _mlp2_kernel(x_ref, w1_ref, wmid_ref, vecs_ref, out_ref, u_sc, v_sc):
    i_tile = pl.program_id(1)

    @pl.when(i_tile == 0)
    def _():
        _fill_uv(x_ref, w1_ref, vecs_ref, u_sc, v_sc)

    tb, ts, s = out_ref.shape
    rank = u_sc.shape[-1]
    h = _pair_hidden(u_sc, v_sc, i_tile, ts)          # (TB, TS, S, R)
    # Mid layer on the MXU (single big matmul); only leading-dim reshapes.
    h2d = h.reshape(tb * ts * s, rank).astype(wmid_ref.dtype)
    bmid = vecs_ref[2:3, :]
    h2 = jnp.maximum(
        jnp.dot(h2d, wmid_ref[...], preferred_element_type=jnp.float32) + bmid,
        0.0).reshape(tb, ts, s, rank)
    wlast = vecs_ref[1:2, :]
    blast = vecs_ref[3:4, 0:1]
    out_ref[...] = jnp.sum(h2 * wlast, axis=-1) + blast


# ------------------------------- wrapper ----------------------------------- #

def _vmem_capacity_bytes():
    try:
        return int(pltpu.get_tpu_info().vmem_capacity_bytes)
    except Exception:
        return 64 * 1024 * 1024   # conservative (v7x per-core VMEM)


def _choose_blocks(b, s, d, rank, two_layers, budget_bytes):
    """Largest (batch block TB, i-row tile TS) whose live VMEM fits the budget.

    TS is a multiple of 8 (or the full S) so output blocks stay sublane-dense.
    >=2 batch blocks are preferred so the 'parallel' batch axis can be sharded
    across v7x's two TensorCores; this is near-free on single-TC v5e/v6e.
    """
    ts_cands = sorted({s} | {t for t in range(8, s, 8) if s % t == 0},
                      reverse=True)
    tb_cands = sorted({t for t in range(1, b + 1) if b % t == 0}, reverse=True)

    def est_bytes(tb, ts):
        f = 4
        io = 2 * (tb * s * d + tb * ts * s) * f                 # double-buffered x / out
        wts = 2 * (d * 2 * rank + 4 * rank
                   + (rank * rank if two_layers else 0)) * f    # weights (dbl-buffered)
        scr = 2 * tb * s * rank * f                             # u_sc + v_sc
        hid = tb * ts * s * rank * f * (2 if two_layers else 1) # live hidden tensor(s)
        fill = tb * s * 2 * rank * f                            # uv temp at fill time
        return io + wts + scr + hid + fill + (1 << 20)          # +1 MiB slack

    def best_for(tbs):
        best = None
        for tb in tbs:
            for ts in ts_cands:
                if est_bytes(tb, ts) > budget_bytes:
                    continue
                key = (tb * ts, ts)
                if best is None or key > best[0]:
                    best = (key, (tb, ts))
        return None if best is None else best[1]

    pick = best_for([t for t in tb_cands if b // t >= 2] or tb_cands)
    if pick is None:
        pick = best_for(tb_cands)
    if pick is None:
        pick = (1, min(ts_cands))       # minimal config; bounded by TS*S*R only
    return pick


def two_word_nn_label_probe(batch, w1, b1, wlast, blast,
                            wmid=None, bmid=None, use_bf16_matmul=False):
    """Pairwise MLP label probe.

    batch: (B, S, D); w1: (RANK, 2D); b1: (RANK,);
    wmid/bmid: (RANK, RANK)/(RANK,) or None (1 hidden layer);
    wlast: (1, RANK); blast: (1,).  Returns (B, S, S) f32 logits.
    """
    b, s, d = batch.shape
    rank = w1.shape[0]
    assert w1.shape == (rank, 2 * d)
    two_layers = wmid is not None

    mm_dtype = jnp.bfloat16 if use_bf16_matmul else jnp.float32

    # ---- batch-invariant weight prep, hoisted out of the grid loop ----
    w1f = jnp.asarray(w1, jnp.float32)
    # Fused (D, 2R): first R columns act on h_i (u), last R on h_j (v).
    w1_fused = jnp.concatenate([w1f[:, :d].T, w1f[:, d:].T],
                               axis=1).astype(mm_dtype)
    zeros_r = jnp.zeros((rank,), jnp.float32)
    vecs = jnp.stack([
        jnp.asarray(b1, jnp.float32).reshape(rank),                       # row 0: b1
        jnp.asarray(wlast, jnp.float32).reshape(rank),                    # row 1: w_last
        (jnp.asarray(bmid, jnp.float32).reshape(rank) if two_layers
         else zeros_r),                                                   # row 2: b_mid
        jnp.broadcast_to(jnp.asarray(blast, jnp.float32).reshape(1),
                         (rank,)),                                        # row 3: b_last
    ])
    x = jnp.asarray(batch, mm_dtype)

    # ---- generation-aware block sizing + explicit VMEM limit ----
    vmem_cap = _vmem_capacity_bytes()
    budget = min(int(0.55 * vmem_cap), 64 * 1024 * 1024)
    vmem_limit = min(int(0.80 * vmem_cap), 112 * 1024 * 1024)
    tb, ts = _choose_blocks(b, s, d, rank, two_layers, budget)
    grid = (b // tb, s // ts)

    in_specs = [
        pl.BlockSpec((tb, s, d), lambda i, j: (i, 0, 0)),      # x: per batch block
        pl.BlockSpec((d, 2 * rank), lambda i, j: (0, 0)),      # fused W1
    ]
    operands = [x, w1_fused]
    if two_layers:
        in_specs.append(pl.BlockSpec((rank, rank), lambda i, j: (0, 0)))
        operands.append(jnp.asarray(wmid, jnp.float32).T.astype(mm_dtype))
    in_specs.append(pl.BlockSpec((4, rank), lambda i, j: (0, 0)))
    operands.append(vecs)

    flops = (2 * b * s * d * 2 * rank        # fused first-layer matmul
             + 2 * b * s * s * rank          # pairwise add + relu
             + 2 * b * s * s * rank          # last-layer multiply-reduce
             + b * s * s)                    # last-layer bias add
    if two_layers:
        flops += 2 * b * s * s * rank * rank + 2 * b * s * s * rank
    elem = 2 if use_bf16_matmul else 4
    bytes_accessed = (elem * (b * s * d + d * 2 * rank
                              + (rank * rank if two_layers else 0))
                      + 4 * (4 * rank + b * s * s))

    kernel = _mlp2_kernel if two_layers else _mlp1_kernel
    out = pl.pallas_call(
        kernel,
        out_shape=jax.ShapeDtypeStruct((b, s, s), jnp.float32),
        grid=grid,
        in_specs=in_specs,
        out_specs=pl.BlockSpec((tb, ts, s), lambda i, j: (i, j, 0)),
        scratch_shapes=[pltpu.VMEM((tb, s, rank), jnp.float32),   # u (b1 folded)
                        pltpu.VMEM((tb, s, rank), jnp.float32)],  # v
        compiler_params=pltpu.CompilerParams(
            dimension_semantics=("parallel", "arbitrary"),
            vmem_limit_bytes=int(vmem_limit)),
        cost_estimate=pl.CostEstimate(
            flops=int(flops), transcendentals=0,
            bytes_accessed=int(bytes_accessed)),
    )(*operands)
    return out


# ------------------------------- reference --------------------------------- #

def _reference(batch, w1, b1, wlast, blast, wmid=None, bmid=None):
    """Pure-JAX mirror of the PyTorch _forward_1 / _forward_2 (eval mode)."""
    B, S, D = batch.shape
    hi = jnp.broadcast_to(batch[:, :, None, :], (B, S, S, D))   # h_i
    hj = jnp.broadcast_to(batch[:, None, :, :], (B, S, S, D))   # h_j
    cat = jnp.concatenate([hi, hj], axis=-1).reshape(-1, 2 * D)
    h = jax.nn.relu(cat @ w1.T + b1)
    if wmid is not None:
        h = jax.nn.relu(h @ wmid.T + bmid)
    return (h @ wlast.T + blast).reshape(B, S, S)


if __name__ == "__main__":
    # Small shapes consistent with the module's forward:
    #   batch_size=2, max_seq_len=8, hidden_dim=32, maximum_rank=16
    B, S, D, RANK = 2, 8, 32, 16

    key = jax.random.PRNGKey(0)
    ks = jax.random.split(key, 7)
    batch = jax.random.normal(ks[0], (B, S, D), dtype=jnp.float32)
    w1 = jax.random.uniform(ks[1], (RANK, 2 * D), jnp.float32, -0.05, 0.05)
    b1 = jax.random.uniform(ks[2], (RANK,), jnp.float32, -0.05, 0.05)
    wmid = jax.random.uniform(ks[3], (RANK, RANK), jnp.float32, -0.05, 0.05)
    bmid = jax.random.uniform(ks[4], (RANK,), jnp.float32, -0.05, 0.05)
    wlast = jax.random.uniform(ks[5], (1, RANK), jnp.float32, -0.05, 0.05)
    blast = jax.random.uniform(ks[6], (1,), jnp.float32, -0.05, 0.05)

    # 1-hidden-layer probe (hidden_layers != 2 branch)
    out1 = two_word_nn_label_probe(batch, w1, b1, wlast, blast)
    jax.block_until_ready(out1)
    ref1 = _reference(batch, w1, b1, wlast, blast)
    assert out1.shape == (B, S, S)
    assert jnp.allclose(out1, ref1, atol=2e-3, rtol=2e-3)

    # 2-hidden-layer probe (hidden_layers == 2 branch)
    out2 = two_word_nn_label_probe(batch, w1, b1, wlast, blast,
                                   wmid=wmid, bmid=bmid)
    jax.block_until_ready(out2)
    ref2 = _reference(batch, w1, b1, wlast, blast, wmid=wmid, bmid=bmid)
    assert out2.shape == (B, S, S)
    assert jnp.allclose(out2, ref2, atol=2e-3, rtol=2e-3)

    # bf16 MXU-input fast path (v6e/v7x); f32 accumulation, looser tolerance.
    out3 = two_word_nn_label_probe(batch, w1, b1, wlast, blast,
                                   wmid=wmid, bmid=bmid, use_bf16_matmul=True)
    jax.block_until_ready(out3)
    assert out3.shape == (B, S, S)
    assert jnp.allclose(out3, ref2, atol=1e-2, rtol=1e-2)

    print("KERNEL_OK")
</pallas_src>

<mosaic_0001>
module attributes {stable_mosaic.version = 11 : i64} {
  func.func @_mlp1_kernel(%arg0: i32, %arg1: i32, %arg2: memref<1x8x32xf32, #tpu.memory_space<vmem>>, %arg3: memref<32x32xf32, #tpu.memory_space<vmem>>, %arg4: memref<4x16xf32, #tpu.memory_space<vmem>>, %arg5: memref<1x8x8xf32, #tpu.memory_space<vmem>>, %arg6: memref<1x8x16xf32, #tpu.memory_space<vmem>>, %arg7: memref<1x8x16xf32, #tpu.memory_space<vmem>>) attributes {dimension_semantics = [#tpu.dimension_semantics<parallel>, #tpu.dimension_semantics<arbitrary>], iteration_bounds = array<i64: 2, 1>, scalar_prefetch = 0 : i64, scratch_operands = 2 : i64, tpu.core_type = #tpu.core_type<tc>, window_params = [{transform_indices = @transform_0, window_bounds = array<i64: 1, 8, 32>}, {pipeline_mode = #tpu.pipeline_mode<synchronous>, transform_indices = @transform_1, window_bounds = array<i64: 32, 32>}, {pipeline_mode = #tpu.pipeline_mode<synchronous>, transform_indices = @transform_2, window_bounds = array<i64: 4, 16>}, {transform_indices = @transform_3, window_bounds = array<i64: 1, 8, 8>}]} {
    %c0_i32 = arith.constant 0 : i32
    %0 = arith.cmpi eq, %arg1, %c0_i32 : i32
    %1 = arith.extui %0 : i1 to i32
    %c0_i32_0 = arith.constant 0 : i32
    %2 = arith.cmpi ne, %1, %c0_i32_0 : i32
    scf.if %2 {
      %c0_11 = arith.constant 0 : index
      %c0_12 = arith.constant 0 : index
      %c0_13 = arith.constant 0 : index
      %25 = vector.load %arg2[%c0_11, %c0_12, %c0_13] : memref<1x8x32xf32, #tpu.memory_space<vmem>>, vector<1x8x32xf32>
      %26 = vector.shape_cast %25 : vector<1x8x32xf32> to vector<8x32xf32>
      %c0_14 = arith.constant 0 : index
      %c0_15 = arith.constant 0 : index
      %27 = vector.load %arg3[%c0_14, %c0_15] : memref<32x32xf32, #tpu.memory_space<vmem>>, vector<32x32xf32>
      %cst_16 = arith.constant dense<0.000000e+00> : vector<8x32xf32>
      %28 = tpu.matmul %26, %27, %cst_16 {dimension_numbers = #tpu.dot_dimension_numbers<[1], [0], [0], [1], [0, 0, 1, 1], [], []>} : vector<8x32xf32>, vector<32x32xf32>, vector<8x32xf32> -> vector<8x32xf32>
      %c0_17 = arith.constant 0 : index
      %c0_18 = arith.constant 0 : index
      %29 = vector.load %arg4[%c0_17, %c0_18] : memref<4x16xf32, #tpu.memory_space<vmem>>, vector<1x16xf32>
      %30 = vector.extract_strided_slice %28 {offsets = [0, 0], sizes = [8, 16], strides = [1, 1]} : vector<8x32xf32> to vector<8x16xf32>
      %31 = vector.broadcast %29 : vector<1x16xf32> to vector<8x16xf32>
      %32 = arith.addf %30, %31 : vector<8x16xf32>
      %33 = vector.shape_cast %32 : vector<8x16xf32> to vector<1x8x16xf32>
      %c0_19 = arith.constant 0 : index
      %c0_20 = arith.constant 0 : index
      %c0_21 = arith.constant 0 : index
      %34 = vector.load %arg6[%c0_19, %c0_20, %c0_21] : memref<1x8x16xf32, #tpu.memory_space<vmem>>, vector<1x8x16xf32>
      tpu.vector_store %arg6[%c0_19, %c0_20, %c0_21], %33 {strides = array<i32>} : memref<1x8x16xf32, #tpu.memory_space<vmem>>, vector<1x8x16xf32>,
      %35 = vector.extract_strided_slice %28 {offsets = [0, 16], sizes = [8, 16], strides = [1, 1]} : vector<8x32xf32> to vector<8x16xf32>
      %36 = vector.shape_cast %35 : vector<8x16xf32> to vector<1x8x16xf32>
      %c0_22 = arith.constant 0 : index
      %c0_23 = arith.constant 0 : index
      %c0_24 = arith.constant 0 : index
      %37 = vector.load %arg7[%c0_22, %c0_23, %c0_24] : memref<1x8x16xf32, #tpu.memory_space<vmem>>, vector<1x8x16xf32>
      tpu.vector_store %arg7[%c0_22, %c0_23, %c0_24], %36 {strides = array<i32>} : memref<1x8x16xf32, #tpu.memory_space<vmem>>, vector<1x8x16xf32>,
    } else {
    }
    %c8_i32 = arith.constant 8 : i32
    %3 = arith.muli %arg1, %c8_i32 : i32
    %4 = tpu.assume_multiple %3, 8 : i32
    %c0 = arith.constant 0 : index
    %5 = arith.index_cast %4 : i32 to index
    %c0_1 = arith.constant 0 : index
    %6 = vector.load %arg6[%c0, %5, %c0_1] : memref<1x8x16xf32, #tpu.memory_space<vmem>>, vector<1x8x16xf32>
    %c0_2 = arith.constant 0 : index
    %c0_3 = arith.constant 0 : index
    %c0_4 = arith.constant 0 : index
    %7 = vector.load %arg7[%c0_2, %c0_3, %c0_4] : memref<1x8x16xf32, #tpu.memory_space<vmem>>, vector<1x8x16xf32>
    %8 = vector.shape_cast %6 : vector<1x8x16xf32> to vector<1x8x1x16xf32>
    %9 = vector.shape_cast %7 : vector<1x8x16xf32> to vector<1x1x8x16xf32>
    %10 = vector.broadcast %8 : vector<1x8x1x16xf32> to vector<1x8x8x16xf32>
    %11 = vector.broadcast %9 : vector<1x1x8x16xf32> to vector<1x8x8x16xf32>
    %12 = arith.addf %10, %11 : vector<1x8x8x16xf32>
    %cst = arith.constant 0.000000e+00 : f32
    %13 = vector.broadcast %cst : f32 to vector<1x8x8x16xf32>
    %14 = arith.maximumf %12, %13 : vector<1x8x8x16xf32>
    %c1 = arith.constant 1 : index
    %c0_5 = arith.constant 0 : index
    %15 = vector.load %arg4[%c1, %c0_5] : memref<4x16xf32, #tpu.memory_space<vmem>>, vector<1x16xf32>
    %c3 = arith.constant 3 : index
    %c0_6 = arith.constant 0 : index
    %16 = vector.load %arg4[%c3, %c0_6] : memref<4x16xf32, #tpu.memory_space<vmem>>, vector<1x1xf32>
    %17 = vector.shape_cast %15 : vector<1x16xf32> to vector<1x1x1x16xf32>
    %18 = vector.broadcast %17 : vector<1x1x1x16xf32> to vector<1x8x8x16xf32>
    %19 = arith.mulf %14, %18 : vector<1x8x8x16xf32>
    %cst_7 = arith.constant dense<0.000000e+00> : vector<1x8x8xf32>
    %20 = vector.multi_reduction <add>, %19, %cst_7 [3] : vector<1x8x8x16xf32> to vector<1x8x8xf32>
    %21 = vector.shape_cast %16 : vector<1x1xf32> to vector<1x1x1xf32>
    %22 = vector.broadcast %21 : vector<1x1x1xf32> to vector<1x8x8xf32>
    %23 = arith.addf %20, %22 : vector<1x8x8xf32>
    %c0_8 = arith.constant 0 : index
    %c0_9 = arith.constant 0 : index
    %c0_10 = arith.constant 0 : index
    %24 = vector.load %arg5[%c0_8, %c0_9, %c0_10] : memref<1x8x8xf32, #tpu.memory_space<vmem>>, vector<1x8x8xf32>
    tpu.vector_store %arg5[%c0_8, %c0_9, %c0_10], %23 {strides = array<i32>} : memref<1x8x8xf32, #tpu.memory_space<vmem>>, vector<1x8x8xf32>,
    return
  }
  func.func @transform_0(%arg0: i32, %arg1: i32) -> (i32, i32, i32) {
    %c0_i32 = arith.constant 0 : i32
    %c0_i32_0 = arith.constant 0 : i32
    %c0_i32_1 = arith.constant 0 : i32
    return %arg0, %c0_i32, %c0_i32_0 : i32, i32, i32
  }
  func.func @transform_1(%arg0: i32, %arg1: i32) -> (i32, i32) {
    %c0_i32 = arith.constant 0 : i32
    %c0_i32_0 = arith.constant 0 : i32
    %c0_i32_1 = arith.constant 0 : i32
    return %c0_i32, %c0_i32_0 : i32, i32
  }
  func.func @transform_2(%arg0: i32, %arg1: i32) -> (i32, i32) {
    %c0_i32 = arith.constant 0 : i32
    %c0_i32_0 = arith.constant 0 : i32
    %c0_i32_1 = arith.constant 0 : i32
    return %c0_i32, %c0_i32_0 : i32, i32
  }
  func.func @transform_3(%arg0: i32, %arg1: i32) -> (i32, i32, i32) {
    %c0_i32 = arith.constant 0 : i32
    %c0_i32_0 = arith.constant 0 : i32
    return %arg0, %arg1, %c0_i32 : i32, i32, i32
  }
}

</mosaic_0001>

<bundles_post_ra>
// kernel: tpu_custom_call.1
= control target key start
LH: loop header
LB: loop body
LE: loop exit
PB: predicated region body
PF: predicated region fallthrough
CT: control target
= control target key end

     0   :  { %8 = vsyncpa [#allocation5], 0  ;;  %s1180_s0 = inlined_call_operand.hbm [shape: f32[2,8,32], index: 0, kind: input, shape index: {}]   ;;  %s1181_s1 = inlined_call_operand.hbm [shape: f32[32,32], index: 1, kind: input, shape index: {}]   ;;  %s1182_s2 = inlined_call_operand.vmem [shape: f32[4,16], index: 2, kind: input, shape index: {}]   ;;  %s1183_s3 = inlined_call_operand.hbm [shape: f32[2,8,8], index: 3, kind: output, shape index: {}]  }
   0x1   :  { %10 = vsyncpa [#allocation5 + $0x1], 0 }
   0x2   :  { %11 = vsyncpa [#allocation8], 0 }
   0x3   :  { %12 = vsyncpa [#allocation6], 0 }
   0x4   :  { %14 = vsyncpa [#allocation6 + $0x1], 0  ;;  %s936_s12 = smov 0   ;;  %s938_s13 = smov 0  }
   0x5   :  { %s940_s14 = smov 0   ;;  %s942_s15 = smov 0  }
   0x6   :  { %s944_s16 = smov 0   ;;  %s946_s17 = smov 0  }
   0x7 LB: > { %s637_s18 = sadd.s32 4294967295, %s904_s17   ;;  %s638_s19 = sadd.s32 4294967294, %s904_s17   ;;  %s904_s17 = sphi %s946_s17, %s20_s17   ;;  %s900_s16 = sphi %s944_s16, %s1207_s16   ;;  %s896_s15 = sphi %s942_s15, %s1206_s15   ;;  %s892_s14 = sphi %s940_s14, %s1205_s14   ;;  %s888_s13 = sphi %s938_s13, %s1204_s13   ;;  %s884_s12 = sphi %s936_s12, %s1203_s12  }
   0x8   : > { %p52_p0 = scmp.ne.s32.totalorder %s888_s13, %s884_s12  ;;  %p970_p1 = scmp.eq.s32.totalorder %s637_s18, 0 }
   0x9   : > { %p974_p2 = scmp.eq.s32.totalorder %s637_s18, 1  ;;  %p126_p3 = scmp.eq.s32.totalorder %s638_s19, 1 }
   0xa   : > { %s1188_s20 = scalar_select %p970_p1, 1, 0 }
   0xb   : > { %s1189_s21 = scalar_select %p974_p2, 1, 0 }
   0xc   : > { %p980_p4 = por %p970_p1, %p52_p0  ;;  %p639_p5 = scmp.ge.s32.totalorder %s904_s17, 1 }
   0xd   : > { %p985_p6 = por %p126_p3, %p52_p0  ;;  %p133_p7 = scmp.lt.s32.totalorder %s904_s17, 3 }
   0xe   : > { %s1190_s22 = scalar_select %p980_p4, 1, 0 }
   0xf   : > { %s1191_s23 = scalar_select %p985_p6, 1, 0 }
  0x10   : > { %p990_p8 = pnand %p639_p5, %p133_p7  ;;  %s906_s25 = smov [#allocation7]  }
  0x11   : > { %s145_s26 = sshll.u32 %s906_s25, 4  ;;  %s32_s28 = sadd.s32 1, %s900_s16  ;;  %s146_s26 = int_to_ptr.vmem [resolvable:$true] %s145_s26 }
  0x12   : > { %s1192_s24 = scalar_select %p990_p8, 1, 0 }
  0x13   : > { %p687_p9 = pneg %p990_p8  ;;  %s760_s4 = scalar_lea.hbm %s1181_s1, 512 }
  0x14   : > { %p761_p12 = scmp.ne.s32.totalorder %s1181_s1, %s760_s4  ;;  %p767_p5 = scmp.lt.u32.totalorder %s760_s4, %s1181_s1 }
  0x15   : > { %p999_p11 = pnand %p687_p9, %p970_p1 }
  0x17   : > { %p762_p13 = pneg %p999_p11 }
  0x19   : > { %p763_p0 = pnand %p762_p13, %p761_p12 }
  0x1b   : > { %p764_p3 = pneg %p763_p0 }
  0x1d   : > { %p769_p7 = pnand %p767_p5, %p764_p3 }
  0x1f   : > { %772 = shalt.err (!%p769_p7)
}
  0x20   : > { %s773_s9 = scalar_lea.vmem %s146_s26, 512  ;;  %p781_p1 = scmp.lt.s32.totalorder %s146_s26, %s146_s26 }
  0x21   : > { %p774_p9 = scmp.ne.s32.totalorder %s146_s26, %s773_s9  ;;  %p782_p4 = scmp.lt.s32.totalorder %s773_s9, %s773_s9 }
  0x23   : > { %p776_p10 = pnand %p774_p9, %p762_p13  ;;  %p783_p8 = por %p782_p4, %p781_p1 }
  0x25   : > { %p777_p6 = pneg %p776_p10 }
  0x27   : > { %p784_p2 = pnand %p783_p8, %p777_p6 }
  0x29   : > { %787 = shalt.err (!%p784_p2)
}
  0x2a   : > { %s907_s10 = smov 128   ;;  %s908_s11 = smov 8  }
  0x2b   : > { %690 = dma.hbm_to_vmem [thread:$0]  (!%p999_p11), %s1181_s1, 512, %s146_s26, [#allocation8], %s907_s10, %s907_s10, %s908_s11  }
  0x2c   : > { %p34_p1 = scmp.ge.s32.totalorder %s32_s28, 2  ;;  %s39_s25 = sadd.s32 1, %s892_s14 }
  0x2d   : > { %p46_p2 = scmp.ne.s32.totalorder %s892_s14, %s888_s13  ;;  %p47_p4 = scmp.eq.s32.totalorder %s904_s17, 0 }
  0x2e   : > { %s1209_s28 = smov (%p34_p1, %s32_s28), 0  ;;  %p1195_p8 = scmp.ne.s32.totalorder %s1189_s21, 0 }
  0x2f   : > { %p1026_p6 = por %p47_p4, %p46_p2  ;;  %s36_s27 = ssub.s32 %s900_s16, %s1209_s28 }
  0x30   : > { %p1032_p10 = por %p1195_p8, %p46_p2  ;;  %p700_p12 = scmp.lt.s32.totalorder %s904_s17, 2 }
  0x31   : > { %p37_p11 = scmp.eq.s32.totalorder %s36_s27, 0  ;;  %s162_s26 = sand.u32 1, %s892_s14  }
  0x32   : > { %s642_s4 = sshll.u32 %s162_s26, 3  ;;  %s643_s6 = sshll.u32 %s900_s16, 7 }
  0x33   : > { %s1041_s5 = scalar_select %p37_p11, %s892_s14, %s39_s25  }
  0x34   : > { %s1047_s9 = scalar_lea.hbm %s1180_s0, %s643_s6  ;;  %s166_s21 = scalar_lea.vmem [#allocation4], %s642_s4 }
  0x35   : > { %s173_s10 = sshll.u32 %s166_s21, 4  ;;  %p1053_p13 = pnand %p700_p12, %p1026_p6  ;;  %s1049_s10 = int_to_ptr.vmem [resolvable:$true] %s173_s10 }
  0x36   : > { %s163_s18 = scalar_lea.sflag [#allocation5], %s162_s26  ;;  %s788_s19 = scalar_lea.hbm %s1047_s9, 128 }
  0x37   : > { %p789_p0 = scmp.ne.s32.totalorder %s1047_s9, %s788_s19  ;;  %p790_p3 = pneg %p1053_p13 }
  0x38   : > { %s793_s4 = scalar_lea.hbm %s1180_s0, 256  ;;  %p794_p9 = scmp.lt.u32.totalorder %s1047_s9, %s1180_s0 }
  0x39   : > { %p791_p5 = pnand %p790_p3, %p789_p0  ;;  %p795_p1 = scmp.lt.u32.totalorder %s793_s4, %s788_s19 }
  0x3a   : > { %p797_p4 = scmp.lt.u32.totalorder %s788_s19, %s1047_s9 }
  0x3b   : > { %p792_p7 = pneg %p791_p5  ;;  %p796_p2 = por %p795_p1, %p794_p9 }
  0x3d   : > { %p798_p6 = por %p797_p4, %p796_p2 }
  0x3f   : > { %p799_p8 = pnand %p798_p6, %p792_p7 }
  0x41   : > { %802 = shalt.err (!%p799_p8)
}
  0x42   : > { %s803_s26 = scalar_lea.vmem %s1049_s10, 128  ;;  %s909_s7 = smov [#allocation4]  }
  0x43   : > { %p804_p12 = scmp.ne.s32.totalorder %s1049_s10, %s803_s26  ;;  %s808_s8 = sshll.u32 %s909_s7, 4  ;;  %s809_s8 = int_to_ptr.vmem [resolvable:$false] %s808_s8 }
  0x44   : > { %s810_s21 = scalar_lea.vmem %s809_s8, 256  ;;  %p811_p5 = scmp.lt.s32.totalorder %s1049_s10, %s809_s8 }
  0x45   : > { %p806_p11 = pnand %p804_p12, %p790_p3  ;;  %p812_p9 = scmp.lt.s32.totalorder %s810_s21, %s803_s26 }
  0x47   : > { %p807_p0 = pneg %p806_p11  ;;  %p813_p1 = por %p812_p9, %p811_p5 }
  0x49   : > { %p814_p2 = pnand %p813_p1, %p807_p0 }
  0x4b   : > { %817 = shalt.err (!%p814_p2)
}
  0x4c   : > { %694 = dma.hbm_to_vmem [thread:$0]  (!%p1053_p13), %s1047_s9, 128, %s1049_s10, %s163_s18  }
  0x4d   : > { %p1198_p7 = scmp.ne.s32.totalorder %s1192_s24, 0 }
  0x4e   : > { %s1085_s19 = sand.u32 (!%p1198_p7), 1, %s888_s13   ;;  %p1199_p3 = scmp.ne.s32.totalorder (!%p1198_p7), %s1190_s22, 0 }
  0x4f   : > { %182 = sbr.rel (%p1198_p7) target bundleno = 628 (0x274), region = 32  ;;  %s645_s25 = sshll.u32 (!%p1198_p7), %s1085_s19, 3 }
  0x50   : > { %s185_s27 = scalar_lea.sflag (!%p1198_p7), [#allocation5], %s1085_s19  ;;  %s188_s4 = scalar_lea.vmem (!%p1198_p7), [#allocation4], %s645_s25 }
  0x56   : > { %871 = dma.done.wait (%p1199_p3), %s185_s27, 128  }
  0x57   : > { %873 = vsyncadd (%p1199_p3), %s185_s27, 4294967168  ;;  %p1200_p13 = scmp.ne.s32.totalorder %s1188_s20, 0 }
  0x59   : > { %875 = dma.done.wait (%p1200_p13), [#allocation8], 512  }
  0x5a   : > { %877 = vsyncadd (%p1200_p13), [#allocation8], 4294966784  ;;  %v910_v0 = vmov 0.0|0.0   ;;  %vm911_vm0 = vmmov 0   ;;  %v912_v1 = vmov 0.0   ;;  %v220_v2 = vld [vmem:[#allocation7] sm:$0xff]  ;;  %v320_v16 = vlaneseq }
  0x5b   : > { %671 = vmatprep.subr.bf16.mxu0 %v910_v0  ;;  %668 = vmatprep.mubr.msk.f32.mxu0 %vm911_vm0, %v912_v1  ;;  %v221_v3 = vld [vmem:[#allocation7 + $0x8] sm:$0xff]  ;;  %v222_v4 = vld [vmem:[#allocation7 + $0x10] sm:$0xff]  ;;  %v223_v6 = vld [vmem:[#allocation7 + $0x18] sm:$0xff]  ;;  %vm224_vm1 = vcmask 261120   ;;  %vm304_vm2 = vcmask 130048   ;;  %s913_s24 = smov 112  }
  0x5c   : > { %v672_v5 = vpack.c.bf16 %v221_v3, %v220_v2  ;;  %v675_v7 = vpack.c.bf16 %v223_v6, %v222_v4  ;;  %v219_v8 = vld [vmem:[%s188_s4] sm:$0xff]  ;;  %v649_v9 = vld [vmem:[%s1182_s2] ss:$0 sm:$0xff]  ;;  %v422_v13 = vld [vmem:[%s1182_s2 + $0x3] sm:$0x1]  ;;  %v1107_v18 = vshrl.u32 %v320_v16, 7 }
  0x5d   : > { %677 = vpush %v422_v13  ;;  %v914_v14 = vmov 1966171168   ;;  %v650_v41 = vld [vmem:[%s1182_s2 + $0x1] ss:$0 sm:$0xff]  ;;  %vm514_vm3 = vcmask 1041409   ;;  %vm516_vm4 = vcmask 1042434  }
  0x5e   : > { %673 = vmatpush3.bf16.msra.mxu0 %v672_v5  ;;  %v318_v15 = vunpack.c.l.s4 %v914_v14  ;;  %v367_v27 = vsub.s32 0, %v1107_v18  ;;  %vm518_vm5 = vcmask 1043459   ;;  %vm520_vm6 = vcmask 1044484   ;;  %s652_s6 = sshll.u32 %s896_s15, 7  ;;  %s214_s26 = scalar_lea.vmem [#allocation9], %s645_s25 }
  0x5f   : > { %674 = vmatprep.subr.bf16.mxu0 %v910_v0  ;;  %vm522_vm7 = vcmask 1045509   ;;  %vm524_vm8 = vcmask 1046534   ;;  %s546_s7 = sshll.u32 %s214_s26, 4  ;;  %vm526_vm9 = vcmask 1047559   ;;  %vm529_vm10 = vcmask 64512   ;;  %s1131_s27 = scalar_lea.hbm %s1183_s3, %s652_s6  ;;  %s1133_s7 = int_to_ptr.vmem [resolvable:$true] %s546_s7 }
  0x60   : > { %v319_v17 = vunpack.c.0.s8 %v318_v15  ;;  %s532_s15 = scalar_lea.sflag [#allocation6], %s1085_s19  ;;  %s818_s25 = scalar_lea.vmem %s1133_s7, 128 }
  0x61   : > { %p819_p4 = scmp.ne.s32.totalorder %s1133_s7, %s818_s25  ;;  %s915_s4 = smov [#allocation9]  }
  0x62   : > { %676 = vmatpush3.bf16.msra.mxu0 %v675_v7  ;;  %v322_v19 = vsub.s32 %v319_v17, %v1107_v18  ;;  %s822_s22 = sshll.u32 %s915_s4, 4  ;;  %s823_s22 = int_to_ptr.vmem [resolvable:$false] %s822_s22 }
  0x63   : > { %p820_p6 = pnand %p819_p4, %p1032_p10  ;;  %s824_s20 = scalar_lea.vmem %s823_s22, 256 }
  0x64   : > { %p825_p12 = scmp.lt.s32.totalorder %s1133_s7, %s823_s22  ;;  %p826_p11 = scmp.lt.s32.totalorder %s824_s20, %s818_s25 }
  0x65   : > { %669 = vmatmul.mubr.msk.f32.vlgmr.msra.gmra.mrb[0].mxu0 %vm224_vm1, %v219_v8  ;;  %p821_p8 = pneg %p820_p6 }
  0x66   : > { %p827_p0 = por %p826_p11, %p825_p12 }
  0x68   : > { %p828_p5 = pnand %p827_p0, %p821_p8 }
  0x8e   : > { %s678_s29 = spop %677 }
 0x138   : > { %v294_v10 = vpop.f32.mrb[0].mxu0 }
 0x139   : > { %v303_v11 = vadd.f32 %v649_v9, %v294_v10  ;;  %307 = vrot.lane.b32.xlu0 %v294_v10, %s913_s24  ;;  %v670_v12 = vpop.f32.mrb[1].mxu0 }
 0x13b   : > { %305 = vst.msk [vmem:[#allocation2] sm:$0xff] %vm304_vm2, %v303_v11 }
 0x142   : > { %v313_v20 = vld [vmem:[#allocation2] sm:$0xff] }
 0x143   : > { %v323_v21 = vrot.slane %v313_v20, %v322_v19  ;;  %v316_v25 = vcombine.high %v313_v20, %v313_v20  ;;  %v462_v20 = vstv %s678_s29 }
 0x145   : > { %v331_v22 = vcombine.high %v323_v21, %v323_v21  ;;  %v339_v23 = vrot.slane %v323_v21, %v322_v19  ;;  %v330_v29 = vrot.slane %v316_v25, %v322_v19 }
 0x147   : > { %v353_v26 = vrot.slane %v331_v22, %v322_v19  ;;  %v361_v28 = vcombine.high %v339_v23, %v339_v23  ;;  %v368_v31 = vrot.slane %v339_v23, %v367_v27  ;;  %v346_v35 = vrot.slane %v330_v29, %v322_v19 }
 0x148   : > { %v332_v36 = vcombine.high %v330_v29, %v330_v29 }
 0x149   : > { %v363_v30 = vcombine.high %v353_v26, %v353_v26  ;;  %v372_v32 = vrot.slane %v353_v26, %v367_v27  ;;  %v376_v33 = vrot.slane %v361_v28, %v367_v27  ;;  %v384_v46 = vrot.slane %v346_v35, %v367_v27 }
 0x14a   : > { %v360_v49 = vrot.slane %v332_v36, %v322_v19  ;;  %v362_v56 = vcombine.high %v346_v35, %v346_v35  ;;  %v481_v19 = vand.u32 127, %v320_v16 }
 0x14b   : > { %v380_v40 = vrot.slane %v363_v30, %v367_v27 }
 0x14c   : > { %v388_v55 = vrot.slane %v360_v49, %v367_v27  ;;  %v392_v61 = vrot.slane %v362_v56, %v367_v27  ;;  %v364_v62 = vcombine.high %v360_v49, %v360_v49  ;;  %v484_v23 = vsub.s32 %v481_v19, %v1107_v18 }
 0x14e   : > { %v396_v3 = vrot.slane %v364_v62, %v367_v27 }
 0x1ab   : > { %v308_v24 = vpop.permute.xlu0 %307 }
 0x1ac   : > { %310 = vst.msk [vmem:[#allocation3] sm:$0xff] %vm304_vm2, %v308_v24 }
 0x1b3   : > { %v314_v34 = vld [vmem:[#allocation3] sm:$0xff] }
 0x1b4   : > { %v405_v37 = vadd.f32 %v368_v31, %v314_v34  ;;  %v406_v38 = vadd.f32 %v372_v32, %v314_v34  ;;  %v407_v39 = vadd.f32 %v376_v33, %v314_v34  ;;  %v408_v45 = vadd.f32 %v380_v40, %v314_v34 }
 0x1b5   : > { %v409_v50 = vadd.f32 %v384_v46, %v314_v34  ;;  %v410_v60 = vadd.f32 %v388_v55, %v314_v34  ;;  %v411_v2 = vadd.f32 %v392_v61, %v314_v34  ;;  %v412_v7 = vadd.f32 %v396_v3, %v314_v34 }
 0x1b6   : > { %v413_v42 = vmax.f32 %v405_v37, 0.0  ;;  %v414_v43 = vmax.f32 %v406_v38, 0.0  ;;  %v415_v44 = vmax.f32 %v407_v39, 0.0  ;;  %v416_v54 = vmax.f32 %v408_v45, 0.0 }
 0x1b7   : > { %v417_v59 = vmax.f32 %v409_v50, 0.0  ;;  %v418_v1 = vmax.f32 %v410_v60, 0.0  ;;  %v419_v6 = vmax.f32 %v411_v2, 0.0  ;;  %v420_v10 = vmax.f32 %v412_v7, 0.0 }
 0x1b8   : > { %v427_v47 = vmul.f32 %v650_v41, %v413_v42  ;;  %v428_v48 = vmul.f32 %v650_v41, %v414_v43  ;;  %v429_v53 = vmul.f32 %v650_v41, %v415_v44  ;;  %v430_v58 = vmul.f32 %v650_v41, %v416_v54 }
 0x1b9   : > { %v431_v0 = vmul.f32 %v650_v41, %v417_v59  ;;  %v432_v5 = vmul.f32 %v650_v41, %v418_v1  ;;  %v433_v9 = vmul.f32 %v650_v41, %v419_v6  ;;  %v434_v12 = vmul.f32 %v650_v41, %v420_v10 }
 0x1ba   : > { %v436_v51 = vsel %vm304_vm2, %v427_v47, 0.0  ;;  %v439_v52 = vsel %vm304_vm2, %v428_v48, 0.0  ;;  %v442_v57 = vsel %vm304_vm2, %v429_v53, 0.0  ;;  %v445_v63 = vsel %vm304_vm2, %v430_v58, 0.0 }
 0x1bb   : > { %437 = vadd.xlane.f32.xlu0 %v436_v51  ;;  %440 = vadd.xlane.f32.xlu1 %v439_v52  ;;  %v448_v4 = vsel %vm304_vm2, %v431_v0, 0.0  ;;  %v451_v8 = vsel %vm304_vm2, %v432_v5, 0.0  ;;  %v454_v11 = vsel %vm304_vm2, %v433_v9, 0.0  ;;  %v457_v13 = vsel %vm304_vm2, %v434_v12, 0.0 }
 0x1bf   : > { %443 = vadd.xlane.f32.xlu1 %v442_v57 }
 0x1c3   : > { %446 = vadd.xlane.f32.xlu1 %v445_v63 }
 0x1c7   : > { %449 = vadd.xlane.f32.xlu1 %v448_v4 }
 0x1cb   : > { %452 = vadd.xlane.f32.xlu1 %v451_v8 }
 0x1cf   : > { %455 = vadd.xlane.f32.xlu1 %v454_v11 }
 0x1d3   : > { %458 = vadd.xlane.f32.xlu1 %v457_v13 }
 0x248   : > { %v441_v14 = vpop.xlane.xlu1 %440  ;;  %v438_v21 = vpop.xlane.xlu0 %437 }
 0x249   : > { %v464_v24 = vadd.f32 %v462_v20, %v438_v21  ;;  %v465_v25 = vadd.f32 %v462_v20, %v441_v14 }
 0x24b   : > { %v485_v30 = vrot.slane %v464_v24, %v484_v23  ;;  %v489_v31 = vrot.slane %v465_v25, %v484_v23 }
 0x24c   : > { %v444_v15 = vpop.xlane.xlu1 %443 }
 0x24d   : > { %v466_v26 = vadd.f32 %v462_v20, %v444_v15  ;;  %v515_v18 = vsel %vm514_vm3, %v489_v31, %v485_v30 }
 0x24f   : > { %v493_v33 = vrot.slane %v466_v26, %v484_v23 }
 0x250   : > { %v447_v17 = vpop.xlane.xlu1 %446 }
 0x251   : > { %v467_v28 = vadd.f32 %v462_v20, %v447_v17  ;;  %v517_v38 = vsel %vm516_vm4, %v493_v33, %v515_v18 }
 0x253   : > { %v497_v16 = vrot.slane %v467_v28, %v484_v23 }
 0x254   : > { %v450_v22 = vpop.xlane.xlu1 %449 }
 0x255   : > { %v468_v29 = vadd.f32 %v462_v20, %v450_v22  ;;  %v519_v41 = vsel %vm518_vm5, %v497_v16, %v517_v38 }
 0x257   : > { %v501_v36 = vrot.slane %v468_v29, %v484_v23 }
 0x258   : > { %v453_v27 = vpop.xlane.xlu1 %452 }
 0x259   : > { %v469_v32 = vadd.f32 %v462_v20, %v453_v27  ;;  %v521_v43 = vsel %vm520_vm6, %v501_v36, %v519_v41 }
 0x25b   : > { %v505_v37 = vrot.slane %v469_v32, %v484_v23 }
 0x25c   : > { %v456_v34 = vpop.xlane.xlu1 %455 }
 0x25d   : > { %v470_v35 = vadd.f32 %v462_v20, %v456_v34  ;;  %v523_v44 = vsel %vm522_vm7, %v505_v37, %v521_v43 }
 0x25f   : > { %v509_v39 = vrot.slane %v470_v35, %v484_v23 }
 0x260   : > { %v459_v40 = vpop.xlane.xlu1 %458 }
 0x261   : > { %v471_v42 = vadd.f32 %v462_v20, %v459_v40  ;;  %v525_v46 = vsel %vm524_vm8, %v509_v39, %v523_v44 }
 0x263   : > { %v513_v45 = vrot.slane %v471_v42, %v484_v23 }
 0x265   : > { %v527_v47 = vsel %vm526_vm9, %v513_v45, %v525_v46 }
 0x266   : > { %530 = vst.msk [vmem:[%s214_s26] sm:$0xff] %vm529_vm10, %v527_v47 }
 0x267   : > { %831 = shalt.err (!%p828_p5)
}
 0x268   : > { %s832_s19 = scalar_lea.hbm %s1131_s27, 128  ;;  %s836_s10 = scalar_lea.hbm %s1183_s3, 256 }
 0x269   : > { %p833_p9 = scmp.ne.s32.totalorder %s1131_s27, %s832_s19  ;;  %p837_p7 = scmp.lt.u32.totalorder %s1131_s27, %s1183_s3 }
 0x26a   : > { %p838_p3 = scmp.lt.u32.totalorder %s836_s10, %s832_s19  ;;  %p840_p4 = scmp.lt.u32.totalorder %s832_s19, %s1131_s27 }
 0x26b   : > { %p834_p1 = pnand %p833_p9, %p1032_p10 }
 0x26c   : > { %p839_p13 = por %p838_p3, %p837_p7 }
 0x26d   : > { %p835_p2 = pneg %p834_p1 }
 0x26e   : > { %p841_p6 = por %p840_p4, %p839_p13 }
 0x270   : > { %p842_p8 = pnand %p841_p6, %p835_p2 }
 0x272   : > { %845 = shalt.err (!%p842_p8)
}
 0x273   : > { %685 = dma.vmem_to_hbm [thread:$0]  (%p1032_p10), %s1133_s7, 128, %s1131_s27, %s532_s15  }
 0x274 PF: > { %s558_s29 = sand.u32 1, %s884_s12   ;;  %p1201_p12 = scmp.ne.s32.totalorder %s1191_s23, 0 }
 0x275   : > { %p1202_p11 = scmp.ge.s32.totalorder %s904_s17, 2  ;;  %s559_s6 = scalar_lea.sflag [#allocation6], %s558_s29 }
 0x277   : > { %p696_p0 = pnand %p1202_p11, %p1201_p12 }
 0x279   : > { %879 = dma.done.wait (!%p696_p0), %s559_s6, 128  }
 0x27a   : > { %881 = vsyncadd (!%p696_p0), %s559_s6, 4294967168  ;;  %s20_s17 = sadd.s32 1, %s904_s17   ;;  %s1203_s12 = smov %s888_s13 }
 0x27b   : > { %p17_p5 = scmp.ge.s32.totalorder %s20_s17, 4   ;;  %s1204_s13 = smov %s892_s14 }
 0x27c   : > { %s1205_s14 = smov %s1041_s5  ;;  %s1206_s15 = smov %s900_s16 }
 0x27d   : > { %s1207_s16 = smov %s1209_s28  ;;  %19 = sbr.rel (!%p17_p5) target bundleno = 7 (0x7), region = 86 }
 0x284   :  { %564 = vsyncpa [#allocation5], 1 }
 0x285   :  { %566 = vsyncpa [#allocation5 + $0x1], 1 }
 0x286   :  { %567 = vsyncpa [#allocation8], 1 }
 0x287   :  { %568 = vsyncpa [#allocation6], 1 }
 0x288   :  { %570 = vsyncpa [#allocation6 + $0x1], 1 }

</bundles_post_ra>
